<compile_context>
chip_gen: v5e
topology: v5e:2x2
jax: 0.10.0
libtpu: 0.0.40
codegen_flags: <defaults>
</compile_context>

<pallas_src>
import jax
import jax.numpy as jnp
from jax.experimental import pallas as pl
from jax.experimental.pallas import tpu as pltpu


# ---------------------------------------------------------------------------
# Kernel 1:  H = relu(A_hat @ (X W1) + b1)          (H emitted in bf16)
# grid = (N/tile row tiles, N/tile reduction tiles); acc_ref is the f32 accumulator.
# ---------------------------------------------------------------------------
def _conv1_kernel(a_ref, x_ref, w1_ref, b1_ref, h_ref, acc_ref):
    k = pl.program_id(1)

    @pl.when(k == 0)
    def _():
        acc_ref[...] = jnp.zeros_like(acc_ref)

    # (tile, in) @ (in, hid): tiny, recomputed per row tile (negligible vs. A matmul).
    xw = jnp.dot(x_ref[...].astype(jnp.bfloat16), w1_ref[...],
                 preferred_element_type=jnp.float32)
    acc_ref[...] += jnp.dot(a_ref[...], xw.astype(jnp.bfloat16),
                            preferred_element_type=jnp.float32)

    @pl.when(k == pl.num_programs(1) - 1)
    def _():
        h_ref[...] = jnp.maximum(acc_ref[...] + b1_ref[...], 0.0).astype(h_ref.dtype)


# ---------------------------------------------------------------------------
# Kernel 2:  out = sigmoid(A_hat @ (H (W2 Wl_out)) + X Wl_in + (b2 Wl_out + bl))
# Fused weights are padded to 128 lanes in the wrapper (only column 0 is real), which
# makes the accumulator and the output store lane-dense at zero extra MXU cost.
# ---------------------------------------------------------------------------
def _conv2_lin_kernel(a_ref, h_ref, w2l_ref, x_ref, wlin_ref, c_ref, out_ref, acc_ref):
    k = pl.program_id(1)

    @pl.when(k == 0)
    def _():
        acc_ref[...] = jnp.zeros_like(acc_ref)

    hw = jnp.dot(h_ref[...], w2l_ref[...], preferred_element_type=jnp.float32)
    acc_ref[...] += jnp.dot(a_ref[...], hw.astype(jnp.bfloat16),
                            preferred_element_type=jnp.float32)

    @pl.when(k == pl.num_programs(1) - 1)
    def _():
        lin_x = jnp.dot(x_ref[...], wlin_ref[...], preferred_element_type=jnp.float32)
        logits = acc_ref[...] + lin_x + c_ref[...]
        out_ref[...] = jax.nn.sigmoid(logits)


def gcn_forward(a_hat, x, params, *, tile=128):
    """a_hat: (N, N) f32 normalized adjacency; x: (N, in_ch) f32 node features."""
    n, in_ch = x.shape
    hid = params["w1"].shape[1]
    lanes = 128

    # Pad the node dimension to a multiple of the tile (zero rows/cols contribute 0).
    n_pad = ((n + tile - 1) // tile) * tile
    a_p = jnp.pad(a_hat, ((0, n_pad - n), (0, n_pad - n))).astype(jnp.bfloat16)
    x_p = jnp.pad(x, ((0, n_pad - n), (0, 0))).astype(jnp.float32)

    # bf16 MXU weights, f32 accumulation / elementwise.
    w1 = params["w1"].astype(jnp.bfloat16)
    b1 = params["b1"].astype(jnp.float32)

    # Fold the Linear into conv2:  lin(cat([conv2(H), x]))
    #   = A_hat @ (H (W2 @ Wl_out)) + X @ Wl_in + (b2 @ Wl_out + bl)
    # and pad the width-1 weights to 128 lanes (column 0 is the real logit column).
    w2l = params["w2"] @ params["wl_out"]                                  # (hid, 1)
    w2l_pad = jnp.zeros((hid, lanes), jnp.float32).at[:, :1].set(w2l).astype(jnp.bfloat16)
    wlin_pad = jnp.zeros((in_ch, lanes), jnp.float32).at[:, :1].set(params["wl_in"])
    c = params["b2"] @ params["wl_out"] + params["bl"]                     # (1, 1)
    c_pad = jnp.zeros((1, lanes), jnp.float32).at[:, :1].set(c)

    grid = (n_pad // tile, n_pad // tile)
    cparams = pltpu.CompilerParams(
        dimension_semantics=("parallel", "arbitrary"),
        vmem_limit_bytes=32 * 1024 * 1024,   # safe on v5e/v6e/v7x; tiles use far less
    )

    # ---- pass 1: H = relu(A_hat @ (X W1) + b1) ----
    cost1 = pl.CostEstimate(
        flops=2 * n_pad * n_pad * hid + 2 * n_pad * in_ch * hid * grid[0],
        transcendentals=0,
        bytes_accessed=n_pad * n_pad * 2 + n_pad * in_ch * 4 * grid[0] + n_pad * hid * 2,
    )
    h = pl.pallas_call(
        _conv1_kernel,
        out_shape=jax.ShapeDtypeStruct((n_pad, hid), jnp.bfloat16),
        grid_spec=pltpu.PrefetchScalarGridSpec(
            num_scalar_prefetch=0,
            grid=grid,
            in_specs=[
                pl.BlockSpec((tile, tile), lambda i, k: (i, k)),    # A_hat tile
                pl.BlockSpec((tile, in_ch), lambda i, k: (k, 0)),   # X rows (reduction)
                pl.BlockSpec((in_ch, hid), lambda i, k: (0, 0)),    # W1
                pl.BlockSpec((1, hid), lambda i, k: (0, 0)),        # b1
            ],
            out_specs=pl.BlockSpec((tile, hid), lambda i, k: (i, 0)),
            scratch_shapes=[pltpu.VMEM((tile, hid), jnp.float32)],
        ),
        compiler_params=cparams,
        cost_estimate=cost1,
    )(a_p, x_p, w1, b1)

    # ---- pass 2: sigmoid(A_hat @ (H W2Wl) + X Wl_in + c), lane-dense (N, 128) output ----
    cost2 = pl.CostEstimate(
        flops=2 * n_pad * n_pad * lanes + 2 * n_pad * hid * lanes * grid[0]
        + 2 * n_pad * in_ch * lanes,
        transcendentals=n_pad * lanes,
        bytes_accessed=n_pad * n_pad * 2 + n_pad * hid * 2 * grid[0]
        + n_pad * in_ch * 4 + n_pad * lanes * 4,
    )
    out = pl.pallas_call(
        _conv2_lin_kernel,
        out_shape=jax.ShapeDtypeStruct((n_pad, lanes), jnp.float32),
        grid_spec=pltpu.PrefetchScalarGridSpec(
            num_scalar_prefetch=0,
            grid=grid,
            in_specs=[
                pl.BlockSpec((tile, tile), lambda i, k: (i, k)),    # A_hat tile
                pl.BlockSpec((tile, hid), lambda i, k: (k, 0)),     # H rows (reduction)
                pl.BlockSpec((hid, lanes), lambda i, k: (0, 0)),    # W2 @ Wl_out (padded)
                pl.BlockSpec((tile, in_ch), lambda i, k: (i, 0)),   # X rows of this tile
                pl.BlockSpec((in_ch, lanes), lambda i, k: (0, 0)),  # Wl_in (padded)
                pl.BlockSpec((1, lanes), lambda i, k: (0, 0)),      # b2 @ Wl_out + bl
            ],
            out_specs=pl.BlockSpec((tile, lanes), lambda i, k: (i, 0)),
            scratch_shapes=[pltpu.VMEM((tile, lanes), jnp.float32)],
        ),
        compiler_params=cparams,
        cost_estimate=cost2,
    )(a_p, h, w2l_pad, x_p, wlin_pad, c_pad)

    # Column 0 of the lane-padded slab == sigmoid(lin(cat([...])).squeeze())
    return out[:n, 0]


def normalized_adjacency(edge_index, num_nodes):
    # Dense D^{-1/2}(A+I)D^{-1/2} from edge_index (2, E); message flows src -> dst.
    # Duplicate edges accumulate (scatter-add) to match PyG's gcn_norm behavior.
    # TODO(synk): for large sparse graphs, replace this dense build + dense matmul with a
    # PrefetchScalarGridSpec edge-list gather/accumulate kernel instead of O(N^2) HBM.
    src, dst = edge_index[0], edge_index[1]
    a = jnp.zeros((num_nodes, num_nodes), jnp.float32)
    a = a.at[dst, src].add(1.0)
    a = a + jnp.eye(num_nodes, dtype=jnp.float32)        # add self-loops (fill_value=1)
    deg = a.sum(axis=1)
    dinv = jnp.where(deg > 0, jax.lax.rsqrt(deg), 0.0)
    return dinv[:, None] * a * dinv[None, :]


if __name__ == "__main__":
    key = jax.random.PRNGKey(0)
    N, E = 256, 1024
    in_ch, hid_ch, out_ch = 4, 32, 8

    k = jax.random.split(key, 6)
    x = jax.random.normal(k[0], (N, in_ch), jnp.float32)        # input.feature
    edge_index = jax.random.randint(k[1], (2, E), 0, N)         # input.edge_index

    # Deterministic synthetic parameters (shapes per GCN.__init__).
    params = {
        "w1": 0.1 * jax.random.normal(k[2], (in_ch, hid_ch), jnp.float32),
        "b1": jnp.zeros((1, hid_ch), jnp.float32),
        "w2": 0.1 * jax.random.normal(k[3], (hid_ch, out_ch), jnp.float32),
        "b2": jnp.zeros((1, out_ch), jnp.float32),
        # nn.Linear(in_ch + out_ch, 1) weight, split to match cat([conv2_out, feature]):
        "wl_out": 0.1 * jax.random.normal(k[4], (out_ch, 1), jnp.float32),
        "wl_in": 0.1 * jax.random.normal(k[5], (in_ch, 1), jnp.float32),
        "bl": 0.01 * jnp.ones((1, 1), jnp.float32),
    }

    a_hat = normalized_adjacency(edge_index, N)
    y = gcn_forward(a_hat, x, params)
    jax.block_until_ready(y)
    assert y.shape == (N,) and y.dtype == jnp.float32

    # Pure-JAX f32 reference of the original (unfused) forward; tolerance covers bf16 MXU inputs.
    h1 = jnp.maximum(a_hat @ (x @ params["w1"]) + params["b1"], 0.0)
    h2 = a_hat @ (h1 @ params["w2"]) + params["b2"]
    y_ref = jax.nn.sigmoid(h2 @ params["wl_out"] + x @ params["wl_in"] + params["bl"])[:, 0]
    assert float(jnp.max(jnp.abs(y - y_ref))) < 3e-2

    print("KERNEL_OK")
</pallas_src>

<mosaic_0001>
module attributes {stable_mosaic.version = 11 : i64} {
  func.func @_conv1_kernel(%arg0: i32, %arg1: i32, %arg2: memref<128x128xbf16, #tpu.memory_space<vmem>>, %arg3: memref<128x4xf32, #tpu.memory_space<vmem>>, %arg4: memref<4x32xbf16, #tpu.memory_space<vmem>>, %arg5: memref<1x32xf32, #tpu.memory_space<vmem>>, %arg6: memref<128x32xbf16, #tpu.memory_space<vmem>>, %arg7: memref<128x32xf32, #tpu.memory_space<vmem>>) attributes {dimension_semantics = [#tpu.dimension_semantics<parallel>, #tpu.dimension_semantics<arbitrary>], iteration_bounds = array<i64: 2, 2>, scalar_prefetch = 0 : i64, scratch_operands = 1 : i64, tpu.core_type = #tpu.core_type<tc>, window_params = [{transform_indices = @transform_0, window_bounds = array<i64: 128, 128>}, {transform_indices = @transform_1, window_bounds = array<i64: 128, 4>}, {pipeline_mode = #tpu.pipeline_mode<synchronous>, transform_indices = @transform_2, window_bounds = array<i64: 4, 32>}, {pipeline_mode = #tpu.pipeline_mode<synchronous>, transform_indices = @transform_3, window_bounds = array<i64: 1, 32>}, {transform_indices = @transform_4, window_bounds = array<i64: 128, 32>}]} {
    %c0_i32 = arith.constant 0 : i32
    %0 = arith.cmpi eq, %arg1, %c0_i32 : i32
    %1 = arith.extui %0 : i1 to i32
    %c0_i32_0 = arith.constant 0 : i32
    %2 = arith.cmpi ne, %1, %c0_i32_0 : i32
    scf.if %2 {
      %cst_12 = arith.constant 0.000000e+00 : f32
      %16 = vector.broadcast %cst_12 : f32 to vector<128x32xf32>
      %c0_13 = arith.constant 0 : index
      %c0_14 = arith.constant 0 : index
      %17 = vector.load %arg7[%c0_13, %c0_14] : memref<128x32xf32, #tpu.memory_space<vmem>>, vector<128x32xf32>
      tpu.vector_store %arg7[%c0_13, %c0_14], %16 {strides = array<i32>} : memref<128x32xf32, #tpu.memory_space<vmem>>, vector<128x32xf32>,
    } else {
    }
    %c0 = arith.constant 0 : index
    %c0_1 = arith.constant 0 : index
    %3 = vector.load %arg3[%c0, %c0_1] : memref<128x4xf32, #tpu.memory_space<vmem>>, vector<128x4xf32>
    %4 = arith.truncf %3 : vector<128x4xf32> to vector<128x4xbf16>
    %c0_2 = arith.constant 0 : index
    %c0_3 = arith.constant 0 : index
    %5 = vector.load %arg4[%c0_2, %c0_3] : memref<4x32xbf16, #tpu.memory_space<vmem>>, vector<4x32xbf16>
    %cst = arith.constant dense<0.000000e+00> : vector<128x32xf32>
    %6 = tpu.matmul %4, %5, %cst {dimension_numbers = #tpu.dot_dimension_numbers<[1], [0], [0], [1], [0, 0, 1, 1], [], []>} : vector<128x4xbf16>, vector<4x32xbf16>, vector<128x32xf32> -> vector<128x32xf32>
    %c0_4 = arith.constant 0 : index
    %c0_5 = arith.constant 0 : index
    %7 = vector.load %arg7[%c0_4, %c0_5] : memref<128x32xf32, #tpu.memory_space<vmem>>, vector<128x32xf32>
    %c0_6 = arith.constant 0 : index
    %c0_7 = arith.constant 0 : index
    %8 = vector.load %arg2[%c0_6, %c0_7] : memref<128x128xbf16, #tpu.memory_space<vmem>>, vector<128x128xbf16>
    %9 = arith.truncf %6 : vector<128x32xf32> to vector<128x32xbf16>
    %cst_8 = arith.constant dense<0.000000e+00> : vector<128x32xf32>
    %10 = tpu.matmul %8, %9, %cst_8 {dimension_numbers = #tpu.dot_dimension_numbers<[1], [0], [0], [1], [0, 0, 1, 1], [], []>} : vector<128x128xbf16>, vector<128x32xbf16>, vector<128x32xf32> -> vector<128x32xf32>
    %11 = arith.addf %7, %10 : vector<128x32xf32>
    %c0_9 = arith.constant 0 : index
    %c0_10 = arith.constant 0 : index
    %12 = vector.load %arg7[%c0_9, %c0_10] : memref<128x32xf32, #tpu.memory_space<vmem>>, vector<128x32xf32>
    tpu.vector_store %arg7[%c0_9, %c0_10], %11 {strides = array<i32>} : memref<128x32xf32, #tpu.memory_space<vmem>>, vector<128x32xf32>,
    %c1_i32 = arith.constant 1 : i32
    %13 = arith.cmpi eq, %arg1, %c1_i32 : i32
    %14 = arith.extui %13 : i1 to i32
    %c0_i32_11 = arith.constant 0 : i32
    %15 = arith.cmpi ne, %14, %c0_i32_11 : i32
    scf.if %15 {
      %c0_12 = arith.constant 0 : index
      %c0_13 = arith.constant 0 : index
      %16 = vector.load %arg7[%c0_12, %c0_13] : memref<128x32xf32, #tpu.memory_space<vmem>>, vector<128x32xf32>
      %c0_14 = arith.constant 0 : index
      %c0_15 = arith.constant 0 : index
      %17 = vector.load %arg5[%c0_14, %c0_15] : memref<1x32xf32, #tpu.memory_space<vmem>>, vector<1x32xf32>
      %18 = vector.broadcast %17 : vector<1x32xf32> to vector<128x32xf32>
      %19 = arith.addf %16, %18 : vector<128x32xf32>
      %cst_16 = arith.constant 0.000000e+00 : f32
      %20 = vector.broadcast %cst_16 : f32 to vector<128x32xf32>
      %21 = arith.maximumf %19, %20 : vector<128x32xf32>
      %22 = arith.truncf %21 : vector<128x32xf32> to vector<128x32xbf16>
      %c0_17 = arith.constant 0 : index
      %c0_18 = arith.constant 0 : index
      %23 = vector.load %arg6[%c0_17, %c0_18] : memref<128x32xbf16, #tpu.memory_space<vmem>>, vector<128x32xbf16>
      tpu.vector_store %arg6[%c0_17, %c0_18], %22 {strides = array<i32>} : memref<128x32xbf16, #tpu.memory_space<vmem>>, vector<128x32xbf16>,
    } else {
    }
    return
  }
  func.func @transform_0(%arg0: i32, %arg1: i32) -> (i32, i32) {
    %c0_i32 = arith.constant 0 : i32
    return %arg0, %arg1 : i32, i32
  }
  func.func @transform_1(%arg0: i32, %arg1: i32) -> (i32, i32) {
    %c0_i32 = arith.constant 0 : i32
    %c0_i32_0 = arith.constant 0 : i32
    return %arg1, %c0_i32 : i32, i32
  }
  func.func @transform_2(%arg0: i32, %arg1: i32) -> (i32, i32) {
    %c0_i32 = arith.constant 0 : i32
    %c0_i32_0 = arith.constant 0 : i32
    %c0_i32_1 = arith.constant 0 : i32
    return %c0_i32, %c0_i32_0 : i32, i32
  }
  func.func @transform_3(%arg0: i32, %arg1: i32) -> (i32, i32) {
    %c0_i32 = arith.constant 0 : i32
    %c0_i32_0 = arith.constant 0 : i32
    %c0_i32_1 = arith.constant 0 : i32
    return %c0_i32, %c0_i32_0 : i32, i32
  }
  func.func @transform_4(%arg0: i32, %arg1: i32) -> (i32, i32) {
    %c0_i32 = arith.constant 0 : i32
    %c0_i32_0 = arith.constant 0 : i32
    return %arg0, %c0_i32 : i32, i32
  }
}

</mosaic_0001>

<bundles_post_ra>
// kernel: tpu_custom_call.1
= control target key start
LH: loop header
LB: loop body
LE: loop exit
PB: predicated region body
PF: predicated region fallthrough
CT: control target
= control target key end

     0   :  { %s1030_s15 = smov 0   ;;  %s1032_s16 = smov 0   ;;  %s1250_s0 = inlined_call_operand.vmem [shape: bf16[256,256], index: 0, kind: input, shape index: {}]   ;;  %s1251_s1 = inlined_call_operand.vmem [shape: f32[256,4], index: 1, kind: input, shape index: {}]   ;;  %s1252_s2 = inlined_call_operand.vmem [shape: bf16[4,32], index: 2, kind: input, shape index: {}]   ;;  %s1253_s3 = inlined_call_operand.vmem [shape: f32[1,32], index: 3, kind: input, shape index: {}]   ;;  %s1254_s4 = inlined_call_operand.vmem [shape: bf16[256,32], index: 4, kind: output, shape index: {}]  }
   0x1   :  { %s1034_s17 = smov 0   ;;  %s1036_s18 = smov 0  }
   0x2   :  { %s1038_s19 = smov 0   ;;  %s1040_s20 = smov 0  }
   0x3   :  { %s1042_s21 = smov 0  }
   0x4 LB: > { %s23_s22 = sadd.s32 1, %s994_s19  ;;  %s26_s23 = sadd.s32 1, %s998_s20  ;;  %s1002_s21 = sphi %s1042_s21, %s14_s21   ;;  %s998_s20 = sphi %s1040_s20, %s1260_s20   ;;  %s994_s19 = sphi %s1038_s19, %s1259_s19   ;;  %s990_s18 = sphi %s1036_s18, %s1258_s18   ;;  %s986_s17 = sphi %s1034_s17, %s1257_s17   ;;  %s982_s16 = sphi %s1032_s16, %s1256_s16   ;;  %s978_s15 = sphi %s1030_s15, %s1255_s15  }
   0x5   : > { %p24_p0 = scmp.ge.s32.totalorder %s23_s22, 2  ;;  %p42_p1 = scmp.ne.s32.totalorder %s982_s16, %s978_s15 }
   0x6   : > { %p43_p2 = scmp.eq.s32.totalorder %s1002_s21, 0  ;;  %s35_s27 = sadd.s32 1, %s982_s16 }
   0x7   : > { %s1262_s22 = smov (%p24_p0, %s23_s22), 0  ;;  %s1264_s23 = smov (!%p24_p0, %s26_s23), %s998_s20 }
   0x8   : > { %p44_p3 = por %p43_p2, %p42_p1  ;;  %p28_p4 = scmp.ge.s32.totalorder %s1264_s23, 2 }
   0x9   : > { %s31_s24 = ssub.s32 %s994_s19, %s1262_s22  ;;  %p817_p6 = scmp.ge.s32.totalorder %s1002_s21, 4 }
   0xa   : > { %s1266_s23 = smov (%p28_p4, %s1264_s23), 0 }
   0xb   : > { %s30_s25 = ssub.s32 %s998_s20, %s1266_s23  ;;  %168 = sbr.rel (%p817_p6) target bundleno = 38 (0x26), region = 24 }
   0xc   : > { %s32_s26 = sor.u32 %s31_s24, %s30_s25 }
   0xd   : > { %p33_p5 = scmp.eq.s32.totalorder %s32_s26, 0 }
   0xf   : > { %s1081_s28 = scalar_select %p33_p5, %s982_s16, %s35_s27  }
  0x10   : > { %171 = sbr.rel (!%p44_p3) target bundleno = 38 (0x26), region = 28  ;;  %s173_s29 = sand.u32 (%p44_p3), 1, %s982_s16  }
  0x11   : > { %s872_s30 = sshll.u32 (%p44_p3), %s998_s20, 5  ;;  %s818_s5 = sshll.u32 (%p44_p3), %s173_s29, 6 }
  0x12   : > { %s178_s6 = sadd.s32 (%p44_p3), %s994_s19, %s872_s30  ;;  %s175_s11 = scalar_lea.vmem (%p44_p3), [#allocation3], %s818_s5 }
  0x13   : > { %s821_s7 = sshll.u32 (%p44_p3), %s178_s6, 2 }
  0x14   : > { %s1090_s10 = scalar_lea.vmem (%p44_p3), %s1250_s0, %s821_s7 }
  0x15   : > { %v197_v0 = vld [vmem:[%s1090_s10] sm:$0xf]  ;;  %v199_v1 = vld [vmem:[%s1090_s10 + $0x8] sm:$0xf]  ;;  %v201_v2 = vld [vmem:[%s1090_s10 + $0x10] sm:$0xf] }
  0x16   : > { %198 = vst [vmem:[%s175_s11] sm:$0xf] %v197_v0  ;;  %v203_v3 = vld [vmem:[%s1090_s10 + $0x18] sm:$0xf]  ;;  %v205_v4 = vld [vmem:[%s1090_s10 + $0x20] sm:$0xf] }
  0x17   : > { %200 = vst [vmem:[%s175_s11 + $0x4] sm:$0xf] %v199_v1  ;;  %v207_v5 = vld [vmem:[%s1090_s10 + $0x28] sm:$0xf]  ;;  %v209_v6 = vld [vmem:[%s1090_s10 + $0x30] sm:$0xf] }
  0x18   : > { %202 = vst [vmem:[%s175_s11 + $0x8] sm:$0xf] %v201_v2  ;;  %v211_v7 = vld [vmem:[%s1090_s10 + $0x38] sm:$0xf]  ;;  %v213_v8 = vld [vmem:[%s1090_s10 + $0x40] sm:$0xf] }
  0x19   : > { %204 = vst [vmem:[%s175_s11 + $0xc] sm:$0xf] %v203_v3  ;;  %v215_v9 = vld [vmem:[%s1090_s10 + $0x48] sm:$0xf]  ;;  %v217_v10 = vld [vmem:[%s1090_s10 + $0x50] sm:$0xf] }
  0x1a   : > { %206 = vst [vmem:[%s175_s11 + $0x10] sm:$0xf] %v205_v4  ;;  %v219_v11 = vld [vmem:[%s1090_s10 + $0x58] sm:$0xf]  ;;  %v221_v12 = vld [vmem:[%s1090_s10 + $0x60] sm:$0xf] }
  0x1b   : > { %208 = vst [vmem:[%s175_s11 + $0x14] sm:$0xf] %v207_v5  ;;  %v223_v13 = vld [vmem:[%s1090_s10 + $0x68] sm:$0xf]  ;;  %v225_v14 = vld [vmem:[%s1090_s10 + $0x70] sm:$0xf] }
  0x1c   : > { %210 = vst [vmem:[%s175_s11 + $0x18] sm:$0xf] %v209_v6  ;;  %v227_v15 = vld [vmem:[%s1090_s10 + $0x78] sm:$0xf] }
  0x1d   : > { %212 = vst [vmem:[%s175_s11 + $0x1c] sm:$0xf] %v211_v7 }
  0x1e   : > { %214 = vst [vmem:[%s175_s11 + $0x20] sm:$0xf] %v213_v8 }
  0x1f   : > { %216 = vst [vmem:[%s175_s11 + $0x24] sm:$0xf] %v215_v9 }
  0x20   : > { %218 = vst [vmem:[%s175_s11 + $0x28] sm:$0xf] %v217_v10 }
  0x21   : > { %220 = vst [vmem:[%s175_s11 + $0x2c] sm:$0xf] %v219_v11 }
  0x22   : > { %222 = vst [vmem:[%s175_s11 + $0x30] sm:$0xf] %v221_v12 }
  0x23   : > { %224 = vst [vmem:[%s175_s11 + $0x34] sm:$0xf] %v223_v13 }
  0x24   : > { %226 = vst [vmem:[%s175_s11 + $0x38] sm:$0xf] %v225_v14 }
  0x25   : > { %228 = vst [vmem:[%s175_s11 + $0x3c] sm:$0xf] %v227_v15 }
  0x26 PF: > { %p822_p7 = scmp.ge.s32.totalorder %s1002_s21, 1  ;;  %p292_p8 = scmp.lt.s32.totalorder %s1002_s21, 5 }
  0x28   : > { %p293_p9 = pnand %p822_p7, %p292_p8 }
  0x29   : > { %s299_s12 = sand.u32 (!%p293_p9), 1, %s978_s15   ;;  %s824_s13 = sshll.u32 (!%p293_p9), %s986_s17, 4 }
  0x2a   : > { %296 = sbr.rel (%p293_p9) target bundleno = 511 (0x1ff), region = 73  ;;  %s823_s14 = sshll.u32 (!%p293_p9), %s299_s12, 6 }
  0x2b   : > { %p331_p10 = scmp.lt.s32.totalorder (!%p293_p9), %s824_s13, 31  ;;  %s826_s24 = sshll.u32 (!%p293_p9), %s990_s18, 4 }
  0x2c   : > { %p337_p11 = scmp.lt.s32.totalorder (!%p293_p9), %s826_s24, 31  ;;  %s1123_s15 = scalar_lea.vmem (!%p293_p9), [#allocation3], %s823_s14 }
  0x2d   : > { %p828_p12 = scmp.ne.s32.totalorder (!%p293_p9), %s986_s17, 0 }
  0x2f   : > { %s1268_s13 = smov (!%p331_p10, %s824_s13), 31  ;;  %s1270_s24 = smov (!%p337_p11, %s826_s24), 31 }
  0x30   : > { %s825_s25 = sshll.u32 %s1268_s13, 3  ;;  %s827_s30 = sshll.u32 %s1270_s24, 2 }
  0x31   : > { %s1116_s29 = scalar_lea.vmem %s1251_s1, %s825_s25  ;;  %s1121_s7 = scalar_lea.vmem %s1254_s4, %s827_s30 }
  0x32   : > { %346 = sbr.rel (%p828_p12) target bundleno = 72 (0x48), region = 81 }
  0x37   : > { %vm347_vm0 = vcmask 261120   ;;  %v1004_v16 = vmov 0.0  }
  0x38   : > { %348 = vst.msk [vmem:[#allocation2] sm:$0xff] %vm347_vm0, %v1004_v16 }
  0x39   : > { %349 = vst.msk [vmem:[#allocation2 + $0x8] sm:$0xff] %vm347_vm0, %v1004_v16 }
  0x3a   : > { %350 = vst.msk [vmem:[#allocation2 + $0x10] sm:$0xff] %vm347_vm0, %v1004_v16 }
  0x3b   : > { %351 = vst.msk [vmem:[#allocation2 + $0x18] sm:$0xff] %vm347_vm0, %v1004_v16 }
  0x3c   : > { %352 = vst.msk [vmem:[#allocation2 + $0x20] sm:$0xff] %vm347_vm0, %v1004_v16 }
  0x3d   : > { %353 = vst.msk [vmem:[#allocation2 + $0x28] sm:$0xff] %vm347_vm0, %v1004_v16 }
  0x3e   : > { %354 = vst.msk [vmem:[#allocation2 + $0x30] sm:$0xff] %vm347_vm0, %v1004_v16 }
  0x3f   : > { %355 = vst.msk [vmem:[#allocation2 + $0x38] sm:$0xff] %vm347_vm0, %v1004_v16 }
  0x40   : > { %356 = vst.msk [vmem:[#allocation2 + $0x40] sm:$0xff] %vm347_vm0, %v1004_v16 }
  0x41   : > { %357 = vst.msk [vmem:[#allocation2 + $0x48] sm:$0xff] %vm347_vm0, %v1004_v16 }
  0x42   : > { %358 = vst.msk [vmem:[#allocation2 + $0x50] sm:$0xff] %vm347_vm0, %v1004_v16 }
  0x43   : > { %359 = vst.msk [vmem:[#allocation2 + $0x58] sm:$0xff] %vm347_vm0, %v1004_v16 }
  0x44   : > { %360 = vst.msk [vmem:[#allocation2 + $0x60] sm:$0xff] %vm347_vm0, %v1004_v16 }
  0x45   : > { %361 = vst.msk [vmem:[#allocation2 + $0x68] sm:$0xff] %vm347_vm0, %v1004_v16 }
  0x46   : > { %362 = vst.msk [vmem:[#allocation2 + $0x70] sm:$0xff] %vm347_vm0, %v1004_v16 }
  0x47   : > { %363 = vst.msk [vmem:[#allocation2 + $0x78] sm:$0xff] %vm347_vm0, %v1004_v16 }
  0x48 PF: > { %v388_v17 = vld [vmem:[%s1252_s2] sm:$0x3]  ;;  %vm414_vm1 = vcmask 1041408   ;;  %v365_v19 = vld [vmem:[%s1116_s29 + $0x8] sm:$0xff]  ;;  %v374_v22 = vld [vmem:[%s1116_s29 + $0x50] sm:$0xff]  ;;  %vm389_vm2 = vcmask 31744  }
  0x49   : > { %v364_v18 = vld [vmem:[%s1116_s29] sm:$0xff]  ;;  %v416_v20 = vsel %vm414_vm1, %v388_v17, 0  ;;  %v375_v23 = vld [vmem:[%s1116_s29 + $0x58] sm:$0xff]  ;;  %v366_v25 = vld [vmem:[%s1116_s29 + $0x10] sm:$0xff]  ;;  %vm620_vm3 = vcmask 261120   ;;  %p869_p13 = scmp.ne.s32.totalorder %s986_s17, 1 }
  0x4a   : > { %v380_v21 = vpack.c.bf16 %v365_v19, %v364_v18  ;;  %425 = vmatpush.bf16.msra.mxu0 %v416_v20  ;;  %881 = vmatpush.bf16.msra.mxu3 %v416_v20  ;;  %v385_v24 = vpack.c.bf16 %v375_v23, %v374_v22  ;;  %v367_v26 = vld [vmem:[%s1116_s29 + $0x18] sm:$0xff]  ;;  %v376_v27 = vld [vmem:[%s1116_s29 + $0x60] sm:$0xff]  ;;  %v377_v28 = vld [vmem:[%s1116_s29 + $0x68] sm:$0xff] }
  0x4b   : > { %v381_v29 = vpack.c.bf16 %v367_v26, %v366_v25  ;;  %v386_v30 = vpack.c.bf16 %v377_v28, %v376_v27  ;;  %v368_v31 = vld [vmem:[%s1116_s29 + $0x20] sm:$0xff]  ;;  %v369_v32 = vld [vmem:[%s1116_s29 + $0x28] sm:$0xff]  ;;  %v378_v33 = vld [vmem:[%s1116_s29 + $0x70] sm:$0xff] }
  0x4c   : > { %v379_v34 = vld [vmem:[%s1116_s29 + $0x78] sm:$0xff]  ;;  %v382_v35 = vpack.c.bf16 %v369_v32, %v368_v31  ;;  %v370_v37 = vld [vmem:[%s1116_s29 + $0x30] sm:$0xff]  ;;  %v372_v40 = vld [vmem:[%s1116_s29 + $0x40] sm:$0xff] }
  0x4d   : > { %829 = vmatmul.msk.bf16.vlgmr.msra.gmra.mxu0 %vm389_vm2, %v380_v21  ;;  %834 = vmatmul.msk.bf16.vlgmr.msra.gmra.mxu3 %vm389_vm2, %v385_v24  ;;  %v387_v36 = vpack.c.bf16 %v379_v34, %v378_v33  ;;  %v371_v38 = vld [vmem:[%s1116_s29 + $0x38] sm:$0xff]  ;;  %v373_v41 = vld [vmem:[%s1116_s29 + $0x48] sm:$0xff]  ;;  %v873_v3 = vld [vmem:[%s1123_s15] sm:$0xff] }
  0x4e   : > { %v383_v39 = vpack.c.bf16 %v371_v38, %v370_v37  ;;  %v384_v42 = vpack.c.bf16 %v373_v41, %v372_v40  ;;  %v877_v4 = vld [vmem:[%s1123_s15 + $0x20] sm:$0xff]  ;;  %v874_v5 = vld [vmem:[%s1123_s15 + $0x8] sm:$0xff]  ;;  %v875_v7 = vld [vmem:[%s1123_s15 + $0x10] sm:$0xff] }
  0x4f   : > { %v878_v6 = vld [vmem:[%s1123_s15 + $0x28] sm:$0xff]  ;;  %v879_v8 = vld [vmem:[%s1123_s15 + $0x30] sm:$0xff]  ;;  %v876_v9 = vld [vmem:[%s1123_s15 + $0x18] sm:$0xff] }
  0x50   : > { %v880_v10 = vld [vmem:[%s1123_s15 + $0x38] sm:$0xff]  ;;  %v467_v11 = vld [vmem:[#allocation2] sm:$0xff]  ;;  %v468_v16 = vld [vmem:[#allocation2 + $0x8] sm:$0xff] }
  0x51   : > { %v475_v14 = vld [vmem:[#allocation2 + $0x40] sm:$0xff]  ;;  %v476_v20 = vld [vmem:[#allocation2 + $0x48] sm:$0xff]  ;;  %v469_v22 = vld [vmem:[#allocation2 + $0x10] sm:$0xff] }
  0x52   : > { %v477_v26 = vld [vmem:[#allocation2 + $0x50] sm:$0xff]  ;;  %v470_v28 = vld [vmem:[#allocation2 + $0x18] sm:$0xff]  ;;  %v471_v34 = vld [vmem:[#allocation2 + $0x20] sm:$0xff] }
  0x53   : > { %v478_v32 = vld [vmem:[#allocation2 + $0x58] sm:$0xff]  ;;  %v479_v38 = vld [vmem:[#allocation2 + $0x60] sm:$0xff]  ;;  %v472_v40 = vld [vmem:[#allocation2 + $0x28] sm:$0xff] }
  0x5d   : > { %830 = vmatmul.msk.bf16.gmra.mxu0 %vm389_vm2, %v381_v29  ;;  %835 = vmatmul.msk.bf16.gmra.mxu3 %vm389_vm2, %v386_v30 }
  0x6d   : > { %831 = vmatmul.msk.bf16.gmra.mxu0 %vm389_vm2, %v382_v35  ;;  %836 = vmatmul.msk.bf16.gmra.mxu3 %vm389_vm2, %v387_v36 }
  0x7d   : > { %832 = vmatmul.msk.bf16.gmra.mxu0 %vm389_vm2, %v383_v39 }
  0x8d   : > { %833 = vmatmul.msk.bf16.gmra.mxu0 %vm389_vm2, %v384_v42 }
  0xca   : > { %v427_v43 = vpop.f32.mrf.mxu0 }
  0xd0   : > { %v452_v44 = vpop.f32.mrf.mxu3 }
  0xd2   : > { %v429_v45 = vpop.f32.mrf.mxu0 }
  0xd3   : > { %v499_v46 = vpack.c.bf16 %v429_v45, %v427_v43 }
  0xd8   : > { %v454_v47 = vpop.f32.mrf.mxu3 }
  0xd9   : > { %v504_v59 = vpack.c.bf16 %v454_v47, %v452_v44  ;;  %v480_v44 = vld [vmem:[#allocation2 + $0x68] sm:$0xff] }
  0xda   : > { %v432_v48 = vpop.f32.mrf.mxu0 }
  0xe0   : > { %v457_v49 = vpop.f32.mrf.mxu3 }
  0xe2   : > { %v434_v50 = vpop.f32.mrf.mxu0 }
  0xe3   : > { %v500_v2 = vpack.c.bf16 %v434_v50, %v432_v48  ;;  %v481_v50 = vld [vmem:[#allocation2 + $0x70] sm:$0xff] }
  0xe8   : > { %v459_v51 = vpop.f32.mrf.mxu3 }
  0xe9   : > { %v505_v58 = vpack.c.bf16 %v459_v51, %v457_v49 }
  0xea   : > { %v437_v52 = vpop.f32.mrf.mxu0 }
  0xf0   : > { %v462_v53 = vpop.f32.mrf.mxu3 }
  0xf2   : > { %v439_v54 = vpop.f32.mrf.mxu0 }
  0xf3   : > { %v501_v1 = vpack.c.bf16 %v439_v54, %v437_v52  ;;  %v474_v52 = vld [vmem:[#allocation2 + $0x38] sm:$0xff] }
  0xf8   : > { %v464_v55 = vpop.f32.mrf.mxu3 }
  0xf9   : > { %v506_v56 = vpack.c.bf16 %v464_v55, %v462_v53 }
  0xfa   : > { %v442_v57 = vpop.f32.mrf.mxu0 }
  0xfb   : > { %555 = vmatpush.bf16.msra.mxu1 %v506_v56  ;;  %882 = vmatpush.bf16.msra.mxu2 %v506_v56  ;;  %v482_v56 = vld [vmem:[#allocation2 + $0x78] sm:$0xff] }
  0xff   : > { %556 = vmatpush.bf16.msra.mxu1 %v505_v58  ;;  %883 = vmatpush.bf16.msra.mxu2 %v505_v58 }
 0x102   : > { %v444_v60 = vpop.f32.mrf.mxu0 }
 0x103   : > { %557 = vmatpush.bf16.msra.mxu1 %v504_v59  ;;  %884 = vmatpush.bf16.msra.mxu2 %v504_v59  ;;  %v502_v0 = vpack.c.bf16 %v444_v60, %v442_v57 }
 0x10a   : > { %v447_v61 = vpop.f32.mrf.mxu0 }
 0x112   : > { %v449_v62 = vpop.f32.mrf.mxu0 }
 0x113   : > { %v503_v63 = vpack.c.bf16 %v449_v62, %v447_v61 }
 0x115   : > { %558 = vmatpush.bf16.msra.mxu1 %v503_v63  ;;  %885 = vmatpush.bf16.msra.mxu2 %v503_v63 }
 0x119   : > { %559 = vmatpush.bf16.msra.mxu1 %v502_v0  ;;  %886 = vmatpush.bf16.msra.mxu2 %v502_v0 }
 0x11d   : > { %560 = vmatpush.bf16.msra.mxu1 %v501_v1  ;;  %887 = vmatpush.bf16.msra.mxu2 %v501_v1 }
 0x121   : > { %561 = vmatpush.bf16.msra.mxu1 %v500_v2  ;;  %888 = vmatpush.bf16.msra.mxu2 %v500_v2 }
 0x125   : > { %562 = vmatpush.bf16.msra.mxu1 %v499_v46  ;;  %889 = vmatpush.bf16.msra.mxu2 %v499_v46  ;;  %v473_v46 = vld [vmem:[#allocation2 + $0x30] sm:$0xff] }
 0x128   : > { %563 = vmatmul.bf16.vlgmr.msra.gmra.mxu1 %v873_v3  ;;  %583 = vmatmul.bf16.vlgmr.msra.gmra.mxu2 %v877_v4 }
 0x138   : > { %568 = vmatmul.bf16.gmra.mxu1 %v874_v5  ;;  %588 = vmatmul.bf16.gmra.mxu2 %v878_v6 }
 0x148   : > { %573 = vmatmul.bf16.gmra.mxu1 %v875_v7  ;;  %593 = vmatmul.bf16.gmra.mxu2 %v879_v8 }
 0x158   : > { %578 = vmatmul.bf16.gmra.mxu1 %v876_v9  ;;  %598 = vmatmul.bf16.gmra.mxu2 %v880_v10 }
 0x1a5   : > { %v564_v12 = vpop.f32.mrf.mxu1 }
 0x1a6   : > { %v604_v13 = vadd.f32 %v564_v12, %v467_v11 }
 0x1a8   : > { %621 = vst.msk [vmem:[#allocation2] sm:$0xff] %vm620_vm3, %v604_v13 }
 0x1ab   : > { %v584_v15 = vpop.f32.mrf.mxu2 }
 0x1ac   : > { %v612_v17 = vadd.f32 %v584_v15, %v475_v14 }
 0x1ad   : > { %v566_v18 = vpop.f32.mrf.mxu1 }
 0x1ae   : > { %629 = vst.msk [vmem:[#allocation2 + $0x40] sm:$0xff] %vm620_vm3, %v612_v17  ;;  %v605_v19 = vadd.f32 %v566_v18, %v468_v16 }
 0x1b0   : > { %622 = vst.msk [vmem:[#allocation2 + $0x8] sm:$0xff] %vm620_vm3, %v605_v19 }
 0x1b3   : > { %v586_v21 = vpop.f32.mrf.mxu2 }
 0x1b4   : > { %v613_v23 = vadd.f32 %v586_v21, %v476_v20 }
 0x1b5   : > { %v569_v24 = vpop.f32.mrf.mxu1 }
 0x1b6   : > { %630 = vst.msk [vmem:[#allocation2 + $0x48] sm:$0xff] %vm620_vm3, %v613_v23  ;;  %v606_v25 = vadd.f32 %v569_v24, %v469_v22 }
 0x1b8   : > { %623 = vst.msk [vmem:[#allocation2 + $0x10] sm:$0xff] %vm620_vm3, %v606_v25 }
 0x1bb   : > { %v589_v27 = vpop.f32.mrf.mxu2 }
 0x1bc   : > { %v614_v29 = vadd.f32 %v589_v27, %v477_v26 }
 0x1bd   : > { %v571_v30 = vpop.f32.mrf.mxu1 }
 0x1be   : > { %631 = vst.msk [vmem:[#allocation2 + $0x50] sm:$0xff] %vm620_vm3, %v614_v29  ;;  %v607_v31 = vadd.f32 %v571_v30, %v470_v28 }
 0x1c0   : > { %624 = vst.msk [vmem:[#allocation2 + $0x18] sm:$0xff] %vm620_vm3, %v607_v31 }
 0x1c3   : > { %v591_v33 = vpop.f32.mrf.mxu2 }
 0x1c4   : > { %v615_v35 = vadd.f32 %v591_v33, %v478_v32 }
 0x1c5   : > { %v574_v36 = vpop.f32.mrf.mxu1 }
 0x1c6   : > { %632 = vst.msk [vmem:[#allocation2 + $0x58] sm:$0xff] %vm620_vm3, %v615_v35  ;;  %v608_v37 = vadd.f32 %v574_v36, %v471_v34 }
 0x1c8   : > { %625 = vst.msk [vmem:[#allocation2 + $0x20] sm:$0xff] %vm620_vm3, %v608_v37 }
 0x1cb   : > { %v594_v39 = vpop.f32.mrf.mxu2 }
 0x1cc   : > { %v616_v41 = vadd.f32 %v594_v39, %v479_v38 }
 0x1cd   : > { %v576_v42 = vpop.f32.mrf.mxu1 }
 0x1ce   : > { %633 = vst.msk [vmem:[#allocation2 + $0x60] sm:$0xff] %vm620_vm3, %v616_v41  ;;  %v609_v43 = vadd.f32 %v576_v42, %v472_v40 }
 0x1d0   : > { %626 = vst.msk [vmem:[#allocation2 + $0x28] sm:$0xff] %vm620_vm3, %v609_v43 }
 0x1d3   : > { %v596_v45 = vpop.f32.mrf.mxu2 }
 0x1d4   : > { %v617_v47 = vadd.f32 %v596_v45, %v480_v44 }
 0x1d5   : > { %v579_v48 = vpop.f32.mrf.mxu1 }
 0x1d6   : > { %634 = vst.msk [vmem:[#allocation2 + $0x68] sm:$0xff] %vm620_vm3, %v617_v47  ;;  %v610_v49 = vadd.f32 %v579_v48, %v473_v46 }
 0x1d8   : > { %627 = vst.msk [vmem:[#allocation2 + $0x30] sm:$0xff] %vm620_vm3, %v610_v49 }
 0x1db   : > { %v599_v51 = vpop.f32.mrf.mxu2 }
 0x1dc   : > { %v618_v53 = vadd.f32 %v599_v51, %v481_v50 }
 0x1dd   : > { %v581_v54 = vpop.f32.mrf.mxu1 }
 0x1de   : > { %635 = vst.msk [vmem:[#allocation2 + $0x70] sm:$0xff] %vm620_vm3, %v618_v53  ;;  %v611_v55 = vadd.f32 %v581_v54, %v474_v52 }
 0x1e0   : > { %628 = vst.msk [vmem:[#allocation2 + $0x38] sm:$0xff] %vm620_vm3, %v611_v55 }
 0x1e2   : > { %640 = sbr.rel (%p869_p13) target bundleno = 511 (0x1ff), region = 85 }
 0x1e3   : > { %v601_v57 = vpop.f32.mrf.mxu2 }
 0x1e4   : > { %v619_v58 = vadd.f32 %v601_v57, %v482_v56 }
 0x1e6   : > { %636 = vst.msk [vmem:[#allocation2 + $0x78] sm:$0xff] %vm620_vm3, %v619_v58 }
 0x1e7   : > { %v641_v59 = vld [vmem:[#allocation2] sm:$0xff]  ;;  %v642_v61 = vld [vmem:[#allocation2 + $0x8] sm:$0xff]  ;;  %v643_v62 = vld [vmem:[#allocation2 + $0x10] sm:$0xff]  ;;  %vm709_vm4 = vcmask 257024  }
 0x1e8   : > { %v947_v60 = vld [vmem:[%s1253_s3] ss:$0 sm:$0xff]  ;;  %v644_v63 = vld [vmem:[#allocation2 + $0x18] sm:$0xff]  ;;  %v646_v5 = vld [vmem:[#allocation2 + $0x28] sm:$0xff] }
 0x1e9   : > { %v661_v0 = vadd.f32 %v947_v60, %v641_v59  ;;  %v662_v1 = vadd.f32 %v947_v60, %v642_v61  ;;  %v663_v2 = vadd.f32 %v947_v60, %v643_v62  ;;  %v664_v3 = vadd.f32 %v947_v60, %v644_v63  ;;  %v645_v4 = vld [vmem:[#allocation2 + $0x20] sm:$0xff]  ;;  %v647_v6 = vld [vmem:[#allocation2 + $0x30] sm:$0xff]  ;;  %v648_v10 = vld [vmem:[#allocation2 + $0x38] sm:$0xff] }
 0x1ea   : > { %v665_v7 = vadd.f32 %v947_v60, %v645_v4  ;;  %v666_v8 = vadd.f32 %v947_v60, %v646_v5  ;;  %v667_v9 = vadd.f32 %v947_v60, %v647_v6  ;;  %v649_v15 = vld [vmem:[#allocation2 + $0x40] sm:$0xff]  ;;  %v668_v19 = vadd.f32 %v947_v60, %v648_v10  ;;  %v650_v20 = vld [vmem:[#allocation2 + $0x48] sm:$0xff]  ;;  %v651_v21 = vld [vmem:[#allocation2 + $0x50] sm:$0xff] }
 0x1eb   : > { %v677_v11 = vmax.f32 %v661_v0, 0.0  ;;  %v678_v12 = vmax.f32 %v662_v1, 0.0  ;;  %v679_v13 = vmax.f32 %v663_v2, 0.0  ;;  %v680_v14 = vmax.f32 %v664_v3, 0.0  ;;  %v652_v22 = vld [vmem:[#allocation2 + $0x58] sm:$0xff]  ;;  %v653_v26 = vld [vmem:[#allocation2 + $0x60] sm:$0xff] }
 0x1ec   : > { %v681_v16 = vmax.f32 %v665_v7, 0.0  ;;  %v682_v17 = vmax.f32 %v666_v8, 0.0  ;;  %v683_v18 = vmax.f32 %v667_v9, 0.0  ;;  %v654_v27 = vld [vmem:[#allocation2 + $0x68] sm:$0xff]  ;;  %v684_v30 = vmax.f32 %v668_v19, 0.0  ;;  %v655_v31 = vld [vmem:[#allocation2 + $0x70] sm:$0xff] }
 0x1ed   : > { %v693_v23 = vpack.c.bf16 %v677_v11, %v677_v11  ;;  %v694_v24 = vpack.c.bf16 %v678_v12, %v678_v12  ;;  %v695_v25 = vpack.c.bf16 %v679_v13, %v679_v13  ;;  %v696_v28 = vpack.c.bf16 %v680_v14, %v680_v14  ;;  %v656_v36 = vld [vmem:[#allocation2 + $0x78] sm:$0xff] }
 0x1ee   : > { %v697_v29 = vpack.c.bf16 %v681_v16, %v681_v16  ;;  %v669_v32 = vadd.f32 %v947_v60, %v649_v15  ;;  %v670_v33 = vadd.f32 %v947_v60, %v650_v20  ;;  %v671_v34 = vadd.f32 %v947_v60, %v651_v21 }
 0x1ef   : > { %710 = vst.msk [vmem:[%s1121_s7] sm:$0xf] %vm709_vm4, %v693_v23  ;;  %v672_v35 = vadd.f32 %v947_v60, %v652_v22  ;;  %v698_v37 = vpack.c.bf16 %v682_v17, %v682_v17  ;;  %v699_v38 = vpack.c.bf16 %v683_v18, %v683_v18  ;;  %v673_v39 = vadd.f32 %v947_v60, %v653_v26 }
 0x1f0   : > { %711 = vst.msk [vmem:[%s1121_s7 + $0x4] sm:$0xf] %vm709_vm4, %v694_v24  ;;  %v674_v40 = vadd.f32 %v947_v60, %v654_v27  ;;  %v685_v41 = vmax.f32 %v669_v32, 0.0  ;;  %v686_v42 = vmax.f32 %v670_v33, 0.0  ;;  %v687_v43 = vmax.f32 %v671_v34, 0.0 }
 0x1f1   : > { %712 = vst.msk [vmem:[%s1121_s7 + $0x8] sm:$0xf] %vm709_vm4, %v695_v25  ;;  %v675_v44 = vadd.f32 %v947_v60, %v655_v31  ;;  %v700_v45 = vpack.c.bf16 %v684_v30, %v684_v30  ;;  %v688_v46 = vmax.f32 %v672_v35, 0.0  ;;  %v676_v47 = vadd.f32 %v947_v60, %v656_v36 }
 0x1f2   : > { %713 = vst.msk [vmem:[%s1121_s7 + $0xc] sm:$0xf] %vm709_vm4, %v696_v28  ;;  %v701_v48 = vpack.c.bf16 %v685_v41, %v685_v41  ;;  %v689_v49 = vmax.f32 %v673_v39, 0.0  ;;  %v702_v50 = vpack.c.bf16 %v686_v42, %v686_v42  ;;  %v690_v51 = vmax.f32 %v674_v40, 0.0 }
 0x1f3   : > { %714 = vst.msk [vmem:[%s1121_s7 + $0x10] sm:$0xf] %vm709_vm4, %v697_v29  ;;  %v703_v52 = vpack.c.bf16 %v687_v43, %v687_v43  ;;  %v691_v53 = vmax.f32 %v675_v44, 0.0  ;;  %v704_v54 = vpack.c.bf16 %v688_v46, %v688_v46  ;;  %v692_v55 = vmax.f32 %v676_v47, 0.0 }
 0x1f4   : > { %715 = vst.msk [vmem:[%s1121_s7 + $0x14] sm:$0xf] %vm709_vm4, %v698_v37  ;;  %v705_v56 = vpack.c.bf16 %v689_v49, %v689_v49  ;;  %v706_v57 = vpack.c.bf16 %v690_v51, %v690_v51 }
 0x1f5   : > { %716 = vst.msk [vmem:[%s1121_s7 + $0x18] sm:$0xf] %vm709_vm4, %v699_v38  ;;  %v707_v58 = vpack.c.bf16 %v691_v53, %v691_v53  ;;  %v708_v59 = vpack.c.bf16 %v692_v55, %v692_v55 }
 0x1f6   : > { %717 = vst.msk [vmem:[%s1121_s7 + $0x1c] sm:$0xf] %vm709_vm4, %v700_v45 }
 0x1f7   : > { %718 = vst.msk [vmem:[%s1121_s7 + $0x20] sm:$0xf] %vm709_vm4, %v701_v48 }
 0x1f8   : > { %719 = vst.msk [vmem:[%s1121_s7 + $0x24] sm:$0xf] %vm709_vm4, %v702_v50 }
 0x1f9   : > { %720 = vst.msk [vmem:[%s1121_s7 + $0x28] sm:$0xf] %vm709_vm4, %v703_v52 }
 0x1fa   : > { %721 = vst.msk [vmem:[%s1121_s7 + $0x2c] sm:$0xf] %vm709_vm4, %v704_v54 }
 0x1fb   : > { %722 = vst.msk [vmem:[%s1121_s7 + $0x30] sm:$0xf] %vm709_vm4, %v705_v56 }
 0x1fc   : > { %723 = vst.msk [vmem:[%s1121_s7 + $0x34] sm:$0xf] %vm709_vm4, %v706_v57 }
 0x1fd   : > { %724 = vst.msk [vmem:[%s1121_s7 + $0x38] sm:$0xf] %vm709_vm4, %v707_v58 }
 0x1fe   : > { %725 = vst.msk [vmem:[%s1121_s7 + $0x3c] sm:$0xf] %vm709_vm4, %v708_v59 }
 0x1ff PF: > { %s14_s21 = sadd.s32 1, %s1002_s21   ;;  %s1255_s15 = smov %s982_s16 }
 0x200   : > { %p11_p0 = scmp.ge.s32.totalorder %s14_s21, 6   ;;  %s1256_s16 = smov %s1081_s28 }
 0x201   : > { %s1257_s17 = smov %s994_s19  ;;  %s1258_s18 = smov %s998_s20 }
 0x202   : > { %s1259_s19 = smov %s1262_s22  ;;  %s1260_s20 = smov %s1266_s23 }
 0x203   :  { %13 = sbr.rel (!%p11_p0) target bundleno = 4 (0x4), region = 123 }

</bundles_post_ra>
